<compile_context>
chip_gen: v7x
topology: tpu7x:2x2x1
jax: 0.10.0
libtpu: 0.0.40
codegen_flags: <defaults>
</compile_context>

<pallas_src>
import jax
import jax.numpy as jnp
import numpy as np
from jax.experimental import pallas as pl
from jax.experimental.pallas import tpu as pltpu  # noqa: F401  (kept for TPU-specific tuning hooks)

block_size = 8   # max sequence length T
n_embd = 32      # embedding dim C
head_size = 16   # attention head size


def head_kernel(xf_ref, w_ref, o_ref):
    # xf_ref: (B*T, C)  batch-flattened input (one fused MXU matmul, M = B*T)
    # w_ref : (C, 3H)   fused [q*scale | k | v] projection weights
    # o_ref : (B, T, H) attention output
    B, T, H = o_ref.shape

    # Fused QKV projection: (B*T, C) @ (C, 3H) -> (B*T, 3H), one MXU pass.
    qkv = jnp.dot(xf_ref[...], w_ref[...], preferred_element_type=jnp.float32)
    qkv = qkv.reshape(B, T, 3 * H)
    q = qkv[..., 0:H]          # 1/sqrt(H) scale already folded into these weights
    k = qkv[..., H:2 * H]
    v = qkv[..., 2 * H:3 * H]

    # Scores: contract over H without materializing k^T (batched MXU matmul).
    wei = jnp.einsum('bqh,bkh->bqk', q, k, preferred_element_type=jnp.float32)

    # Causal (lower-triangular) mask: positions with col > row get -inf.
    row = jax.lax.broadcasted_iota(jnp.int32, (B, T, T), 1)
    col = jax.lax.broadcasted_iota(jnp.int32, (B, T, T), 2)
    wei = jnp.where(col <= row, wei, -jnp.inf)

    # Numerically stable softmax along the key axis (diagonal is never masked,
    # so no all--inf rows).
    wei = wei - jnp.max(wei, axis=-1, keepdims=True)
    p = jnp.exp(wei)
    denom = jnp.sum(p, axis=-1, keepdims=True)
    # Exact reciprocal keeps the 1e-4 match vs. the pure-JAX reference;
    # approx=True would route it to the otherwise-idle EUP slot.
    p = p * pl.reciprocal(denom, approx=False)

    # Attention-weighted value sum: (B, T, T) x (B, T, H) -> (B, T, H).
    out = jnp.einsum('bqk,bkh->bqh', p, v, preferred_element_type=jnp.float32)
    o_ref[...] = out.astype(o_ref.dtype)


def head_forward(x, wk, wq, wv):
    B, T, C = x.shape
    H = wk.shape[1]
    scale = jnp.float32(H) ** -0.5

    # Fuse the three projections into one (C, 3H) weight; fold the attention
    # scale into the query slice (constant folding happens at trace time).
    w_qkv = jnp.concatenate([wq * scale, wk, wv], axis=1)   # (C, 3H)
    xf = x.reshape(B * T, C)                                # flatten outside the kernel

    # Single grid step: everything (inputs, scores, output) is < 16 KiB, so it
    # lives fully resident in VMEM on v5e / v6e / v7x.
    # TODO(synk): if T ever scales to >= 1024, switch to a flash-style
    # q-block x kv-block online-softmax tiling (re-derived for v7x's 64 MiB VMEM).
    return pl.pallas_call(
        head_kernel,
        out_shape=jax.ShapeDtypeStruct((B, T, H), jnp.float32),
        in_specs=[
            pl.BlockSpec((B * T, C), lambda: (0, 0)),
            pl.BlockSpec((C, 3 * H), lambda: (0, 0)),
        ],
        out_specs=pl.BlockSpec((B, T, H), lambda: (0, 0, 0)),
    )(xf, w_qkv)


def head_reference(x, wk, wq, wv):
    # Pure-JAX reference matching the PyTorch forward.
    k = x @ wk
    q = x @ wq
    v = x @ wv
    wei = (q @ jnp.swapaxes(k, -2, -1)) * (k.shape[-1] ** -0.5)
    T = x.shape[1]
    tril = jnp.tril(jnp.ones((T, T)))
    wei = jnp.where(tril == 0, -jnp.inf, wei)
    wei = jax.nn.softmax(wei, axis=-1)
    return wei @ v


if __name__ == "__main__":
    key = jax.random.PRNGKey(0)
    kx, kk, kq, kv = jax.random.split(key, 4)

    B, T, C, H = 2, block_size, n_embd, head_size

    # Deterministic inputs and parameters (nn.Linear-like uniform init, bias=False).
    x = jax.random.normal(kx, (B, T, C), dtype=jnp.float32)
    bound = 1.0 / np.sqrt(C)
    # Stored as (C, H) == PyTorch weight (H, C) transposed.
    wk = jax.random.uniform(kk, (C, H), jnp.float32, -bound, bound)
    wq = jax.random.uniform(kq, (C, H), jnp.float32, -bound, bound)
    wv = jax.random.uniform(kv, (C, H), jnp.float32, -bound, bound)

    out = head_forward(x, wk, wq, wv)
    out = jax.block_until_ready(out)

    ref = head_reference(x, wk, wq, wv)
    np.testing.assert_allclose(np.asarray(out), np.asarray(ref), rtol=1e-4, atol=1e-4)

    print("KERNEL_OK")
</pallas_src>

<mosaic_0001>
module attributes {stable_mosaic.version = 11 : i64} {
  func.func @head_kernel(%arg0: memref<16x32xf32, #tpu.memory_space<vmem>>, %arg1: memref<32x48xf32, #tpu.memory_space<vmem>>, %arg2: memref<2x8x16xf32, #tpu.memory_space<vmem>>) attributes {dimension_semantics = [], scalar_prefetch = 0 : i64, scratch_operands = 0 : i64, tpu.core_type = #tpu.core_type<tc>} {
    %c0 = arith.constant 0 : index
    %c0_0 = arith.constant 0 : index
    %0 = vector.load %arg0[%c0, %c0_0] : memref<16x32xf32, #tpu.memory_space<vmem>>, vector<16x32xf32>
    %c0_1 = arith.constant 0 : index
    %c0_2 = arith.constant 0 : index
    %1 = vector.load %arg1[%c0_1, %c0_2] : memref<32x48xf32, #tpu.memory_space<vmem>>, vector<32x48xf32>
    %cst = arith.constant dense<0.000000e+00> : vector<16x48xf32>
    %2 = tpu.matmul %0, %1, %cst {dimension_numbers = #tpu.dot_dimension_numbers<[1], [0], [0], [1], [0, 0, 1, 1], [], []>} : vector<16x32xf32>, vector<32x48xf32>, vector<16x48xf32> -> vector<16x48xf32>
    %3 = vector.shape_cast %2 : vector<16x48xf32> to vector<2x8x48xf32>
    %4 = vector.extract_strided_slice %3 {offsets = [0, 0, 0], sizes = [2, 8, 16], strides = [1, 1, 1]} : vector<2x8x48xf32> to vector<2x8x16xf32>
    %5 = vector.extract_strided_slice %3 {offsets = [0, 0, 16], sizes = [2, 8, 16], strides = [1, 1, 1]} : vector<2x8x48xf32> to vector<2x8x16xf32>
    %6 = vector.extract_strided_slice %3 {offsets = [0, 0, 32], sizes = [2, 8, 16], strides = [1, 1, 1]} : vector<2x8x48xf32> to vector<2x8x16xf32>
    "tpu.trace_start"() <{level = 10 : i32, message = "bqh,bkh->bqk"}> : () -> ()
    %cst_3 = arith.constant dense<0.000000e+00> : vector<2x8x8xf32>
    %7 = tpu.matmul %4, %5, %cst_3 {dimension_numbers = #tpu.dot_dimension_numbers<[2], [2], [1], [1], [0, 0, 0, 1, 1, 1], [0], [0]>} : vector<2x8x16xf32>, vector<2x8x16xf32>, vector<2x8x8xf32> -> vector<2x8x8xf32>
    "tpu.trace_stop"() : () -> ()
    %8 = tpu.iota {dimensions = array<i32: 1>} : vector<2x8x8xi32>
    %9 = tpu.iota {dimensions = array<i32: 2>} : vector<2x8x8xi32>
    %10 = arith.cmpi sle, %9, %8 : vector<2x8x8xi32>
    %cst_4 = arith.constant 0xFF800000 : f32
    %11 = vector.broadcast %cst_4 : f32 to vector<2x8x8xf32>
    %12 = arith.select %10, %7, %11 : vector<2x8x8xi1>, vector<2x8x8xf32>
    %cst_5 = arith.constant dense<0xFF800000> : vector<2x8xf32>
    %13 = vector.multi_reduction <maximumf>, %12, %cst_5 [2] : vector<2x8x8xf32> to vector<2x8xf32>
    %14 = vector.shape_cast %13 : vector<2x8xf32> to vector<2x8x1xf32>
    %15 = vector.broadcast %14 : vector<2x8x1xf32> to vector<2x8x8xf32>
    %16 = arith.subf %12, %15 : vector<2x8x8xf32>
    %17 = math.exp %16 : vector<2x8x8xf32>
    %cst_6 = arith.constant dense<0.000000e+00> : vector<2x8xf32>
    %18 = vector.multi_reduction <add>, %17, %cst_6 [2] : vector<2x8x8xf32> to vector<2x8xf32>
    %19 = vector.shape_cast %18 : vector<2x8xf32> to vector<2x8x1xf32>
    %20 = tpu.reciprocal %19 : vector<2x8x1xf32> -> vector<2x8x1xf32>
    %21 = vector.broadcast %20 : vector<2x8x1xf32> to vector<2x8x8xf32>
    %22 = arith.mulf %17, %21 : vector<2x8x8xf32>
    "tpu.trace_start"() <{level = 10 : i32, message = "bqk,bkh->bqh"}> : () -> ()
    %cst_7 = arith.constant dense<0.000000e+00> : vector<2x8x16xf32>
    %23 = tpu.matmul %22, %6, %cst_7 {dimension_numbers = #tpu.dot_dimension_numbers<[2], [1], [1], [2], [0, 0, 0, 1, 1, 2], [0], [0]>} : vector<2x8x8xf32>, vector<2x8x16xf32>, vector<2x8x16xf32> -> vector<2x8x16xf32>
    "tpu.trace_stop"() : () -> ()
    %c0_8 = arith.constant 0 : index
    %c0_9 = arith.constant 0 : index
    %c0_10 = arith.constant 0 : index
    %24 = vector.load %arg2[%c0_8, %c0_9, %c0_10] : memref<2x8x16xf32, #tpu.memory_space<vmem>>, vector<2x8x16xf32>
    tpu.vector_store %arg2[%c0_8, %c0_9, %c0_10], %23 {strides = array<i32>} : memref<2x8x16xf32, #tpu.memory_space<vmem>>, vector<2x8x16xf32>,
    return
  }
}

</mosaic_0001>

<bundles_post_ra>
// kernel: tpu_custom_call.1
= control target key start
LH: loop header
LB: loop body
LE: loop exit
PB: predicated region body
PF: predicated region fallthrough
CT: control target
= control target key end

     0   :  { %7 = vsyncpa [#allocation3], 0  ;;  %s720_s0 = inlined_call_operand.hbm [shape: f32[16,32], index: 0, kind: input, shape index: {}]   ;;  %s721_s1 = inlined_call_operand.hbm [shape: f32[32,48], index: 1, kind: input, shape index: {}]   ;;  %s722_s2 = inlined_call_operand.hbm [shape: f32[2,8,16], index: 2, kind: output, shape index: {}]  }
   0x1   :  { %8 = vsyncpa [#allocation6], 0 }
   0x2   :  { %9 = vsyncpa [#allocation4], 0  ;;  %s635_s9 = smov [#allocation2]   ;;  %s563_s13 = scalar_lea.hbm %s720_s0, 256 }
   0x3   :  { %s15_s10 = sshll.u32 %s635_s9, 4  ;;  %p564_p0 = scmp.ne.s32.totalorder %s720_s0, %s563_s13  ;;  %s16_s10 = int_to_ptr.vmem [resolvable:$true] %s15_s10 }
   0x4   :  { %p567_p1 = scmp.lt.u32.totalorder %s563_s13, %s720_s0 }
   0x6   :  { %p569_p2 = pnand %p567_p1, %p564_p0 }
   0x8   :  { %572 = shalt.err (!%p569_p2)
}
   0x9   :  { %s573_s18 = scalar_lea.vmem %s16_s10, 256  ;;  %p578_p4 = scmp.lt.s32.totalorder %s16_s10, %s16_s10 }
   0xa   :  { %p574_p3 = scmp.ne.s32.totalorder %s16_s10, %s573_s18  ;;  %p579_p5 = scmp.lt.s32.totalorder %s573_s18, %s573_s18 }
   0xc   :  { %p580_p6 = por %p579_p5, %p578_p4 }
   0xe   :  { %p581_p7 = pnand %p580_p6, %p574_p3 }
  0x10   :  { %584 = shalt.err (!%p581_p7)
}
  0x11   :  { %s636_s19 = smov 128   ;;  %s637_s20 = smov 8  }
  0x12   :  { %21 = dma.hbm_to_vmem [thread:$0]  %s720_s0, 256, %s16_s10, [#allocation3], %s636_s19, %s636_s19, %s637_s20  }
  0x13   :  { %s638_s23 = smov [#allocation5]   ;;  %s585_s27 = scalar_lea.hbm %s721_s1, 512 }
  0x14   :  { %s27_s24 = sshll.u32 %s638_s23, 4  ;;  %p586_p8 = scmp.ne.s32.totalorder %s721_s1, %s585_s27  ;;  %s28_s24 = int_to_ptr.vmem [resolvable:$true] %s27_s24 }
  0x15   :  { %p589_p9 = scmp.lt.u32.totalorder %s585_s27, %s721_s1 }
  0x17   :  { %p591_p10 = pnand %p589_p9, %p586_p8 }
  0x19   :  { %594 = shalt.err (!%p591_p10)
}
  0x1a   :  { %s595_s4 = scalar_lea.vmem %s28_s24, 512  ;;  %p600_p12 = scmp.lt.s32.totalorder %s28_s24, %s28_s24 }
  0x1b   :  { %p596_p11 = scmp.ne.s32.totalorder %s28_s24, %s595_s4  ;;  %p601_p13 = scmp.lt.s32.totalorder %s595_s4, %s595_s4 }
  0x1d   :  { %p602_p0 = por %p601_p13, %p600_p12 }
  0x1f   :  { %p603_p1 = pnand %p602_p0, %p596_p11 }
  0x21   :  { %606 = shalt.err (!%p603_p1)
}
  0x22   :  { %33 = dma.hbm_to_vmem [thread:$0]  %s721_s1, 512, %s28_s24, [#allocation6], %s636_s19, %s636_s19, %s637_s20  }
  0x23   :  { %629 = dma.done.wait [#allocation3], 256  }
  0x24   :  { %630 = vsyncadd [#allocation3], 4294967040 }
  0x25   :  { %631 = dma.done.wait [#allocation6], 512  }
  0x26   :  { %632 = vsyncadd [#allocation6], 4294966784  ;;  %vm46_vm0 = vcmask 261120   ;;  %v42_v0 = vld [vmem:[#allocation5] sm:$0xff]  ;;  %v43_v1 = vld [vmem:[#allocation5 + $0x8] sm:$0xff]  ;;  %v639_v8 = vmov 0.0   ;;  %v283_v13 = vlaneseq }
  0x27   :  { %v44_v2 = vld [vmem:[#allocation5 + $0x10] sm:$0xff]  ;;  %v538_v3 = vpack.c.bf16 %v43_v1, %v42_v0  ;;  %v45_v4 = vld [vmem:[#allocation5 + $0x18] sm:$0xff]  ;;  %518 = vmatprep.subr.mxu1 %v639_v8  ;;  %vm640_vm1 = vmmov 0   ;;  %s641_s1 = smov 112   ;;  %vm131_vm2 = vcmask 130048   ;;  %vm290_vm4 = vcmask 64512  }
  0x28   :  { %v40_v5 = vld [vmem:[#allocation2] sm:$0xff]  ;;  %v542_v6 = vpack.c.bf16 %v45_v4, %v44_v2  ;;  %v41_v7 = vld [vmem:[#allocation2 + $0x8] sm:$0xff]  ;;  %520 = vmatprep.mubr.msk.f32.mxu1 %vm640_vm1, %v639_v8  ;;  %v284_v14 = vshrl.u32 %v283_v13, 7  ;;  %v286_v15 = vand.u32 127, %v283_v13  ;;  %s642_s6 = smov 96   ;;  %s643_s7 = smov [#allocation7]  }
  0x29   :  { %515 = vmatprep.mubr.msk.f32.mxu0 %vm46_vm0, %v40_v5  ;;  %539 = vmatprep.subr.bf16.mxu0 %v538_v3  ;;  %s472_s8 = sshll.u32 %s643_s7, 4  ;;  %s473_s8 = int_to_ptr.vmem [resolvable:$true] %s472_s8 }
  0x2a   :  { %541 = vmatpush3.bf16.msra.mxu0 %v538_v3  ;;  %vm287_vm3 = vcmp.le.s32.totalorder %v286_v15, %v284_v14  ;;  %s607_s9 = scalar_lea.vmem %s473_s8, 256  ;;  %p612_p3 = scmp.lt.s32.totalorder %s473_s8, %s473_s8 }
  0x2b   :  { %543 = vmatprep.subr.bf16.mxu0 %v542_v6  ;;  %p608_p2 = scmp.ne.s32.totalorder %s473_s8, %s607_s9  ;;  %p613_p4 = scmp.lt.s32.totalorder %s607_s9, %s607_s9 }
  0x2d   :  { %p614_p5 = por %p613_p4, %p612_p3 }
  0x2e   :  { %545 = vmatpush3.bf16.msra.mxu0 %v542_v6 }
  0x2f   :  { %528 = vmatprep.subr.mxu0 %v639_v8  ;;  %p615_p6 = pnand %p614_p5, %p608_p2 }
  0x31   :  { %516 = vmatmul.mubr.msk.f32.vlgmr.msra.gmra.mrb[0].mxu0 %vm46_vm0, %v41_v7 }
  0x32   :  { %530 = vmatprep.mubr.msk.f32.mxu0 %vm640_vm1, %v639_v8 }
 0x104   :  { %v517_v9 = vpop.f32.mrb[0].mxu0 }
 0x105   :  { %v119_v10 = vpop.f32.mrb[1].mxu0 }
 0x106   :  { %129 = vrot.lane.b32.xlu0 %v119_v10, %s641_s1 }
 0x10a   :  { %207 = vrot.lane.b32.xlu0 %v517_v9, %s641_s1 }
 0x178   :  { %v130_v11 = vpop.permute.xlu0 %129 }
 0x179   :  { %519 = vmatpush3.xpose.msk.msra.mxu1 %vm131_vm2, %v130_v11 }
 0x17a   :  { %523 = vmatprep.subr.mxu1 %v639_v8 }
 0x17c   :  { %521 = vmatmul.mubr.msk.f32.vlgmr.msra.gmra.mrb[0].mxu1 %vm131_vm2, %v119_v10  ;;  %v208_v12 = vpop.permute.xlu0 %207 }
 0x17d   :  { %524 = vmatpush3.xpose.msk.msra.mxu1 %vm131_vm2, %v208_v12  ;;  %525 = vmatprep.mubr.msk.f32.mxu1 %vm640_vm1, %v639_v8 }
 0x17e   :  { %533 = vmatprep.subr.mxu1 %v639_v8 }
 0x180   :  { %526 = vmatmul.mubr.msk.f32.vlgmr.msra.gmra.mrb[2].mxu1 %vm131_vm2, %v517_v9 }
 0x181   :  { %535 = vmatprep.mubr.msk.f32.mxu1 %vm640_vm1, %v639_v8 }
 0x24f   :  { %v202_v16 = vpop.f32.mrb[0].mxu1 }
 0x250   :  { %v288_v17 = vsel %vm287_vm3, %v202_v16, -inf  ;;  %v522_v18 = vpop.f32.mrb[1].mxu1 }
 0x251   :  { %v291_v19 = vsel %vm290_vm4, %v288_v17, -inf }
 0x252   :  { %292 = vmax.xlane.f32.xlu1 %v291_v19 }
 0x253   :  { %v279_v20 = vpop.f32.mrb[2].mxu1 }
 0x254   :  { %v289_v21 = vsel %vm287_vm3, %v279_v20, -inf  ;;  %v527_v22 = vpop.f32.mrb[3].mxu1 }
 0x255   :  { %v294_v23 = vsel %vm290_vm4, %v289_v21, -inf }
 0x256   :  { %295 = vmax.xlane.f32.xlu1 %v294_v23 }
 0x267   :  { %313 = vrot.lane.b32.xlu1 %v119_v10, %s642_s6 }
 0x2df   :  { %v293_v24 = vpop.xlane.xlu1 %292 }
 0x2e0   :  { %v297_v25 = vsub.f32 %v288_v17, %v293_v24 }
 0x2e2   :  { %v299_v26 = vmul.f32 1.442695, %v297_v25 }
 0x2e3   :  { %v296_v27 = vpop.xlane.xlu1 %295 }
 0x2e4   :  { %555 = vpow2.f32 %v299_v26  ;;  %v298_v28 = vsub.f32 %v289_v21, %v296_v27 }
 0x2e6   :  { %v301_v29 = vmul.f32 1.442695, %v298_v28 }
 0x2e7   :  { %v314_v30 = vpop.permute.xlu1 %313 }
 0x2e8   :  { %557 = vpow2.f32 %v301_v29  ;;  %529 = vmatpush3.msra.mxu0 %v314_v30 }
 0x2ee   :  { %v556_v31 = vpop.eup %555 }
 0x2ef   :  { %v303_v32 = vsel %vm290_vm4, %v556_v31, 0.0 }
 0x2f0   :  { %304 = vadd.xlane.f32.xlu0 %v303_v32 }
 0x2f2   :  { %v558_v33 = vpop.eup %557 }
 0x2f3   :  { %v306_v34 = vsel %vm290_vm4, %v558_v33, 0.0 }
 0x2f4   :  { %307 = vadd.xlane.f32.xlu1 %v306_v34 }
 0x305   :  { %389 = vrot.lane.b32.xlu1 %v517_v9, %s642_s6 }
 0x37d   :  { %v305_v35 = vpop.xlane.xlu0 %304 }
 0x37e   :  { %559 = vrcp.f32 %v305_v35 }
 0x381   :  { %v308_v36 = vpop.xlane.xlu1 %307 }
 0x382   :  { %561 = vrcp.f32 %v308_v36 }
 0x385   :  { %v390_v37 = vpop.permute.xlu1 %389 }
 0x386   :  { %534 = vmatpush3.msra.mxu1 %v390_v37 }
 0x388   :  { %v560_v38 = vpop.eup %559 }
 0x389   :  { %v311_v39 = vmul.f32 %v560_v38, %v556_v31 }
 0x38b   :  { %531 = vmatmul.mubr.msk.f32.vlgmr.msra.gmra.mrb[2].mxu0 %vm290_vm4, %v311_v39 }
 0x38c   :  { %v562_v40 = vpop.eup %561 }
 0x38d   :  { %v312_v41 = vmul.f32 %v562_v40, %v558_v33 }
 0x38f   :  { %536 = vmatmul.mubr.msk.f32.vlgmr.msra.gmra.mrb[4].mxu1 %vm290_vm4, %v312_v41 }
 0x45e   :  { %v385_v42 = vpop.f32.mrb[2].mxu0 }
 0x45f   :  { %465 = vst.msk [vmem:[#allocation7] sm:$0xff] %vm131_vm2, %v385_v42  ;;  %v532_v43 = vpop.f32.mrb[3].mxu0 }
 0x462   :  { %v461_v44 = vpop.f32.mrb[4].mxu1 }
 0x463   :  { %466 = vst.msk [vmem:[#allocation7 + $0x8] sm:$0xff] %vm131_vm2, %v461_v44  ;;  %v537_v45 = vpop.f32.mrb[5].mxu1 }
 0x464   :  { %618 = shalt.err (!%p615_p6)
}
 0x465   :  { %s619_s12 = scalar_lea.hbm %s722_s2, 256 }
 0x466   :  { %p620_p7 = scmp.ne.s32.totalorder %s722_s2, %s619_s12  ;;  %p623_p8 = scmp.lt.u32.totalorder %s619_s12, %s722_s2 }
 0x468   :  { %p625_p9 = pnand %p623_p8, %p620_p7 }
 0x46a   :  { %628 = shalt.err (!%p625_p9)
}
 0x46b   :  { %478 = dma.vmem_to_hbm [thread:$0]  %s473_s8, 256, %s722_s2, [#allocation4], %s636_s19, %s636_s19, %s637_s20  }
 0x46c   :  { %633 = dma.done.wait [#allocation4], 256  }
 0x46d   :  { %634 = vsyncadd [#allocation4], 4294967040 }
 0x46e   :  { %482 = vsyncpa [#allocation3], 1 }
 0x46f   :  { %483 = vsyncpa [#allocation6], 1 }
 0x470   :  { %484 = vsyncpa [#allocation4], 1 }

</bundles_post_ra>
